<compile_context>
chip_gen: v7x
topology: tpu7x:2x2x1
jax: 0.10.0
libtpu: 0.0.40
codegen_flags: <defaults>
</compile_context>

<pallas_src>
import math

import jax
import jax.numpy as jnp
from jax import lax
from jax.experimental import pallas as pl
from jax.experimental.pallas import tpu as pltpu

EPS = 1e-8
_LANE = 128
_SUBLANE = 8
_SPLIT_BYTES = 8 * 1024 * 1024  # only add a 2nd batch grid step above this


def _cdiv(a, b):
    return -(-a // b)


def _round_up(x, m):
    return _cdiv(x, m) * m


def _round_down(x, m):
    return (x // m) * m


def _vmem_capacity_bytes():
    try:
        return int(pltpu.get_tpu_info().vmem_capacity_bytes)
    except Exception:
        return 64 * 1024 * 1024  # conservative: v7x per-TC VMEM


def _distance(sxy, sxx, syy):
    # cos = sxy / max(sqrt(sxx*syy), EPS) == sxy * rsqrt(max(sxx*syy, EPS^2))
    denom_sq = jnp.maximum(sxx * syy, jnp.float32(EPS * EPS))
    return 1.0 - sxy * lax.rsqrt(denom_sq)


# ---------------------------------------------------------------------------
# Kernels
# ---------------------------------------------------------------------------
def _cosine_kernel_2d(x_ref, y_ref, o_ref):
    """(block_b, D) blocks; whole feature axis in one block."""
    x = x_ref[...]
    y = y_ref[...]
    # Products in the input dtype, accumulation in f32 (keeps bf16 off the
    # VALU ceiling on v7x; identical to f32 math for f32 inputs).
    sxy = jnp.sum((x * y).astype(jnp.float32), axis=1, keepdims=True)
    sxx = jnp.sum((x * x).astype(jnp.float32), axis=1, keepdims=True)
    syy = jnp.sum((y * y).astype(jnp.float32), axis=1, keepdims=True)
    o_ref[...] = _distance(sxy, sxx, syy)


def _make_cosine_kernel_2d_dtiled(D, block_d, needs_mask):
    """Large D: accumulate partial sums over a trailing 'arbitrary' grid axis.

    The final D-chunk may be ragged; it is masked in-kernel (col < D) before
    the products so OOB garbage never enters the reductions.
    """

    def kernel(x_ref, y_ref, o_ref, sxy_ref, sxx_ref, syy_ref):
        k = pl.program_id(1)

        @pl.when(k == 0)
        def _init():
            sxy_ref[...] = jnp.zeros_like(sxy_ref)
            sxx_ref[...] = jnp.zeros_like(sxx_ref)
            syy_ref[...] = jnp.zeros_like(syy_ref)

        x = x_ref[...]
        y = y_ref[...]
        if needs_mask:
            col = k * block_d + lax.broadcasted_iota(jnp.int32, x.shape, 1)
            valid = col < D
            zero = jnp.zeros((), x.dtype)
            x = jnp.where(valid, x, zero)
            y = jnp.where(valid, y, zero)

        sxy_ref[...] += jnp.sum((x * y).astype(jnp.float32), axis=1, keepdims=True)
        sxx_ref[...] += jnp.sum((x * x).astype(jnp.float32), axis=1, keepdims=True)
        syy_ref[...] += jnp.sum((y * y).astype(jnp.float32), axis=1, keepdims=True)

        @pl.when(k == pl.num_programs(1) - 1)
        def _finalize():
            o_ref[...] = _distance(sxy_ref[...], sxx_ref[...], syy_ref[...])

    return kernel


def _cosine_kernel_3d(x_ref, y_ref, o_ref):
    """(block_b, C, block_s) blocks in the original NC* layout; reduce axis=1.

    Output (block_b, block_s) is naturally lane-dense.
    """
    x = x_ref[...]
    y = y_ref[...]
    sxy = jnp.sum((x * y).astype(jnp.float32), axis=1)
    sxx = jnp.sum((x * x).astype(jnp.float32), axis=1)
    syy = jnp.sum((y * y).astype(jnp.float32), axis=1)
    o_ref[...] = _distance(sxy, sxx, syy)


# ---------------------------------------------------------------------------
# Tiling helpers
# ---------------------------------------------------------------------------
def _vmem_budgets(vmem_block_budget, vmem_limit_bytes):
    cap = _vmem_capacity_bytes()
    if vmem_limit_bytes is None:
        vmem_limit_bytes = min(cap * 3 // 4, 96 * 1024 * 1024)
    if vmem_block_budget is None:
        vmem_block_budget = vmem_limit_bytes // 2
    return cap, vmem_block_budget, vmem_limit_bytes


def _pick_block_b(B, row_bytes, budget, total_hbm_bytes=0,
                  split_bytes_threshold=_SPLIT_BYTES):
    rows = max(1, budget // max(row_bytes, 1))
    if rows >= B:
        block_b, num_b = B, 1
    else:
        block_b = max(_SUBLANE, _round_down(rows, _SUBLANE))
        num_b = _cdiv(B, block_b)
    # v7x megacore: give the 'parallel' batch axis >= 2 steps of *real* rows,
    # but only when the problem is large enough that the extra ~0.35us grid
    # step is noise on single-TC chips (v5e/v6e).  Never a padding-only block.
    if (num_b == 1 and B >= 2 * _SUBLANE
            and total_hbm_bytes >= split_bytes_threshold):
        block_b = _round_up(_cdiv(B, 2), _SUBLANE)
        num_b = _cdiv(B, block_b)
    return block_b, num_b


# ---------------------------------------------------------------------------
# Wrappers
# ---------------------------------------------------------------------------
def _cosine_distance_2d(x1, x2, *,
                        d_block_max=None,
                        vmem_block_budget=None,
                        vmem_limit_bytes=None,
                        split_bytes_threshold=_SPLIT_BYTES):
    """1 - cosine_similarity(x1, x2, dim=1) for 2D (B, D) inputs (f32 result)."""
    B, D = x1.shape
    itemsize = jnp.dtype(x1.dtype).itemsize
    cap, vmem_block_budget, vmem_limit_bytes = _vmem_budgets(
        vmem_block_budget, vmem_limit_bytes)
    if d_block_max is None:
        d_block_max = 4096 if cap <= 64 * 1024 * 1024 else 8192
    d_block_max = max(_LANE, _round_down(d_block_max, _LANE))

    total_hbm_bytes = 2 * B * D * itemsize
    out_shape = jax.ShapeDtypeStruct((B, 1), jnp.float32)
    params = pltpu.CompilerParams  # alias for brevity

    if D <= d_block_max:
        # Single pass over the feature axis; block_d = D is legal even when
        # D % 128 != 0 (block dim equal to the full array dim) -> no pad copy.
        block_d = D
        # 2 inputs x 2 pipeline buffers + ~3 f32 product temporaries + output.
        row_bytes = 2 * 2 * block_d * itemsize + 3 * block_d * 4 + 2 * _LANE * 4
        block_b, num_b = _pick_block_b(B, row_bytes, vmem_block_budget,
                                       total_hbm_bytes, split_bytes_threshold)
        out = pl.pallas_call(
            _cosine_kernel_2d,
            out_shape=out_shape,
            grid_spec=pltpu.PrefetchScalarGridSpec(
                num_scalar_prefetch=0,
                grid=(num_b,),
                in_specs=[
                    pl.BlockSpec((block_b, block_d), lambda i: (i, 0)),
                    pl.BlockSpec((block_b, block_d), lambda i: (i, 0)),
                ],
                out_specs=pl.BlockSpec((block_b, 1), lambda i: (i, 0)),
            ),
            compiler_params=params(
                dimension_semantics=("parallel",),
                vmem_limit_bytes=vmem_limit_bytes,
            ),
        )(x1, x2)
    else:
        # Huge D: tile the feature axis (multiple of 128), mask the ragged tail
        # in-kernel, accumulate in f32 VMEM scratch.
        block_d = d_block_max
        num_d = _cdiv(D, block_d)
        needs_mask = (D % block_d) != 0
        row_bytes = (2 * 2 * block_d * itemsize + 3 * block_d * 4
                     + (2 + 3) * _LANE * 4)
        block_b, num_b = _pick_block_b(B, row_bytes, vmem_block_budget,
                                       total_hbm_bytes, split_bytes_threshold)
        kernel = _make_cosine_kernel_2d_dtiled(D, block_d, needs_mask)
        out = pl.pallas_call(
            kernel,
            out_shape=out_shape,
            grid_spec=pltpu.PrefetchScalarGridSpec(
                num_scalar_prefetch=0,
                grid=(num_b, num_d),  # reduction axis last
                in_specs=[
                    pl.BlockSpec((block_b, block_d), lambda i, k: (i, k)),
                    pl.BlockSpec((block_b, block_d), lambda i, k: (i, k)),
                ],
                out_specs=pl.BlockSpec((block_b, 1), lambda i, k: (i, 0)),
                scratch_shapes=[pltpu.VMEM((block_b, 1), jnp.float32)] * 3,
            ),
            compiler_params=params(
                dimension_semantics=("parallel", "arbitrary"),
                vmem_limit_bytes=vmem_limit_bytes,
            ),
        )(x1, x2)

    return out.reshape(B)


def _cosine_distance_nd(x1, x2, *,
                        vmem_block_budget=None,
                        vmem_limit_bytes=None,
                        split_bytes_threshold=_SPLIT_BYTES,
                        **kwargs):
    """ndim > 2 inputs (B, C, *spatial): reduce dim=1 in the original layout."""
    B, C = x1.shape[0], x1.shape[1]
    spatial = x1.shape[2:]
    S = math.prod(spatial)
    itemsize = jnp.dtype(x1.dtype).itemsize
    cap, vmem_block_budget, vmem_limit_bytes = _vmem_budgets(
        vmem_block_budget, vmem_limit_bytes)

    # Per spatial position, per batch row: 2 inputs x 2 buffers + ~3 f32 temps.
    col_bytes = C * (2 * 2 * itemsize + 3 * 4)
    min_s = S if S < _LANE else _LANE
    if col_bytes * max(min_s, 1) > vmem_block_budget:
        # TODO(synk): enormous channel counts fall back to a transpose + 2D
        # D-tiled pass (extra HBM traffic); rare in practice.
        x1m = jnp.moveaxis(x1, 1, -1).reshape(-1, C)
        x2m = jnp.moveaxis(x2, 1, -1).reshape(-1, C)
        out = _cosine_distance_2d(
            x1m, x2m, vmem_block_budget=vmem_block_budget,
            vmem_limit_bytes=vmem_limit_bytes,
            split_bytes_threshold=split_bytes_threshold, **kwargs)
        return out.reshape((B,) + spatial)

    # Collapsing trailing contiguous dims is layout-preserving (no HBM pass).
    x1r = x1.reshape(B, C, S)
    x2r = x2.reshape(B, C, S)

    # Spatial (lane) block: full S when it fits, otherwise a multiple of 128.
    per_row_cap = max(col_bytes * max(min_s, 1), vmem_block_budget // 8)
    if col_bytes * S <= per_row_cap:
        block_s = S
    else:
        block_s = max(_LANE, _round_down(per_row_cap // col_bytes, _LANE))
    num_s = _cdiv(S, block_s)

    row_bytes = col_bytes * block_s + 2 * block_s * 4  # + double-buffered out
    total_hbm_bytes = 2 * B * C * S * itemsize
    # If the spatial grid already has >= 2 steps, megacore has parallelism; no
    # need to split the batch axis.
    split_bytes = total_hbm_bytes if num_s == 1 else 0
    block_b, num_b = _pick_block_b(B, row_bytes, vmem_block_budget,
                                   split_bytes, split_bytes_threshold)

    out = pl.pallas_call(
        _cosine_kernel_3d,
        out_shape=jax.ShapeDtypeStruct((B, S), jnp.float32),
        grid_spec=pltpu.PrefetchScalarGridSpec(
            num_scalar_prefetch=0,
            grid=(num_b, num_s),
            in_specs=[
                pl.BlockSpec((block_b, C, block_s), lambda i, j: (i, 0, j)),
                pl.BlockSpec((block_b, C, block_s), lambda i, j: (i, 0, j)),
            ],
            out_specs=pl.BlockSpec((block_b, block_s), lambda i, j: (i, j)),
        ),
        compiler_params=pltpu.CompilerParams(
            dimension_semantics=("parallel", "parallel"),
            vmem_limit_bytes=vmem_limit_bytes,
        ),
    )(x1r, x2r)
    return out.reshape((B,) + spatial)


def cosine_distance(input1, input2, **kwargs):
    """Forward of the PyTorch `Cosine` module: 1 - CosineSimilarity(dim=1)."""
    assert input1.shape == input2.shape and input1.ndim >= 2, \
        "expected matching inputs with ndim >= 2"
    if input1.ndim == 2:
        out = _cosine_distance_2d(input1, input2, **kwargs)
    else:
        out = _cosine_distance_nd(input1, input2, **kwargs)
    # PyTorch returns the input dtype; internal math is f32.
    out_dtype = jnp.result_type(input1.dtype, input2.dtype)
    if jnp.issubdtype(out_dtype, jnp.floating):
        out = out.astype(out_dtype)
    return out


# ---------------------------------------------------------------------------
# Reference + self-test
# ---------------------------------------------------------------------------
def _reference(x1, x2):
    dot = jnp.sum(x1 * x2, axis=1)
    denom = jnp.maximum(
        jnp.linalg.norm(x1, axis=1) * jnp.linalg.norm(x2, axis=1), EPS)
    return 1.0 - dot / denom


if __name__ == "__main__":
    key = jax.random.PRNGKey(0)
    k1, k2, k3, k4, k5, k6 = jax.random.split(key, 6)

    # (batch, hidden) embeddings: single-pass path, D not a multiple of 128.
    B, D = 8, 32
    x1 = jax.random.normal(k1, (B, D), dtype=jnp.float32)
    x2 = jax.random.normal(k2, (B, D), dtype=jnp.float32)
    dist = jax.block_until_ready(cosine_distance(x1, x2))
    ref = _reference(x1, x2)
    assert dist.shape == (B,)
    assert jnp.allclose(dist, ref, atol=1e-5, rtol=1e-5)

    # Odd batch + forced small D block: exercises the D-tiled accumulator path
    # with a ragged, in-kernel-masked final D chunk (no wrapper padding).
    B2, D2 = 6, 300
    y1 = jax.random.normal(k3, (B2, D2), dtype=jnp.float32)
    y2 = jax.random.normal(k4, (B2, D2), dtype=jnp.float32)
    dist2 = jax.block_until_ready(cosine_distance(y1, y2, d_block_max=128))
    ref2 = _reference(y1, y2)
    assert dist2.shape == (B2,)
    assert jnp.allclose(dist2, ref2, atol=1e-5, rtol=1e-5)

    # NCHW-style input: 3-D kernel reduces channel axis in the original layout
    # (no moveaxis / transpose pass).
    z1 = jax.random.normal(k5, (2, 4, 8, 8), dtype=jnp.float32)
    z2 = jax.random.normal(k6, (2, 4, 8, 8), dtype=jnp.float32)
    dist3 = jax.block_until_ready(cosine_distance(z1, z2))
    ref3 = _reference(z1, z2)
    assert dist3.shape == (2, 8, 8)
    assert jnp.allclose(dist3, ref3, atol=1e-5, rtol=1e-5)

    print("KERNEL_OK")
</pallas_src>

<mosaic_0001>
module attributes {stable_mosaic.version = 11 : i64} {
  func.func @_cosine_kernel_2d(%arg0: i32, %arg1: memref<8x32xf32, #tpu.memory_space<vmem>>, %arg2: memref<8x32xf32, #tpu.memory_space<vmem>>, %arg3: memref<8x1xf32, #tpu.memory_space<vmem>>) attributes {dimension_semantics = [#tpu.dimension_semantics<parallel>], iteration_bounds = array<i64: 1>, scalar_prefetch = 0 : i64, scratch_operands = 0 : i64, tpu.core_type = #tpu.core_type<tc>, window_params = [{transform_indices = @transform_0, window_bounds = array<i64: 8, 32>}, {transform_indices = @transform_1, window_bounds = array<i64: 8, 32>}, {transform_indices = @transform_2, window_bounds = array<i64: 8, 1>}]} {
    %c0 = arith.constant 0 : index
    %c0_0 = arith.constant 0 : index
    %0 = vector.load %arg1[%c0, %c0_0] : memref<8x32xf32, #tpu.memory_space<vmem>>, vector<8x32xf32>
    %c0_1 = arith.constant 0 : index
    %c0_2 = arith.constant 0 : index
    %1 = vector.load %arg2[%c0_1, %c0_2] : memref<8x32xf32, #tpu.memory_space<vmem>>, vector<8x32xf32>
    %2 = arith.mulf %0, %1 : vector<8x32xf32>
    %cst = arith.constant dense<0.000000e+00> : vector<8xf32>
    %3 = vector.multi_reduction <add>, %2, %cst [1] : vector<8x32xf32> to vector<8xf32>
    %4 = vector.shape_cast %3 : vector<8xf32> to vector<8x1xf32>
    %5 = arith.mulf %0, %0 : vector<8x32xf32>
    %cst_3 = arith.constant dense<0.000000e+00> : vector<8xf32>
    %6 = vector.multi_reduction <add>, %5, %cst_3 [1] : vector<8x32xf32> to vector<8xf32>
    %7 = vector.shape_cast %6 : vector<8xf32> to vector<8x1xf32>
    %8 = arith.mulf %1, %1 : vector<8x32xf32>
    %cst_4 = arith.constant dense<0.000000e+00> : vector<8xf32>
    %9 = vector.multi_reduction <add>, %8, %cst_4 [1] : vector<8x32xf32> to vector<8xf32>
    %10 = vector.shape_cast %9 : vector<8xf32> to vector<8x1xf32>
    %11 = arith.mulf %7, %10 : vector<8x1xf32>
    %cst_5 = arith.constant 1.000000e-16 : f32
    %12 = vector.broadcast %cst_5 : f32 to vector<8x1xf32>
    %13 = arith.maximumf %11, %12 : vector<8x1xf32>
    %14 = math.rsqrt %13 : vector<8x1xf32>
    %15 = arith.mulf %4, %14 : vector<8x1xf32>
    %cst_6 = arith.constant 1.000000e+00 : f32
    %16 = vector.broadcast %cst_6 : f32 to vector<8x1xf32>
    %17 = arith.subf %16, %15 : vector<8x1xf32>
    %c0_7 = arith.constant 0 : index
    %c0_8 = arith.constant 0 : index
    %18 = vector.load %arg3[%c0_7, %c0_8] : memref<8x1xf32, #tpu.memory_space<vmem>>, vector<8x1xf32>
    tpu.vector_store %arg3[%c0_7, %c0_8], %17 {strides = array<i32>} : memref<8x1xf32, #tpu.memory_space<vmem>>, vector<8x1xf32>,
    return
  }
  func.func @transform_0(%arg0: i32) -> (i32, i32) {
    %c0_i32 = arith.constant 0 : i32
    %c0_i32_0 = arith.constant 0 : i32
    return %arg0, %c0_i32 : i32, i32
  }
  func.func @transform_1(%arg0: i32) -> (i32, i32) {
    %c0_i32 = arith.constant 0 : i32
    %c0_i32_0 = arith.constant 0 : i32
    return %arg0, %c0_i32 : i32, i32
  }
  func.func @transform_2(%arg0: i32) -> (i32, i32) {
    %c0_i32 = arith.constant 0 : i32
    %c0_i32_0 = arith.constant 0 : i32
    return %arg0, %c0_i32 : i32, i32
  }
}

</mosaic_0001>

<bundles_post_ra>
// kernel: tpu_custom_call.1
= control target key start
LH: loop header
LB: loop body
LE: loop exit
PB: predicated region body
PF: predicated region fallthrough
CT: control target
= control target key end

     0   :  { %7 = vsyncpa [#allocation3], 0  ;;  %s159_s0 = inlined_call_operand.hbm [shape: f32[8,32], index: 0, kind: input, shape index: {}]   ;;  %s160_s1 = inlined_call_operand.hbm [shape: f32[8,32], index: 1, kind: input, shape index: {}]   ;;  %s161_s2 = inlined_call_operand.vmem [shape: f32[8,1], index: 2, kind: output, shape index: {}]  }
   0x1   :  { %8 = vsyncpa [#allocation5], 0  ;;  %s115_s9 = smov [#allocation2]   ;;  %s116_s11 = smov [#allocation4]  }
   0x2   :  { %s15_s10 = sshll.u32 %s115_s9, 4  ;;  %s25_s12 = sshll.u32 %s116_s11, 4  ;;  %s16_s10 = int_to_ptr.vmem [resolvable:$true] %s15_s10  ;;  %s26_s12 = int_to_ptr.vmem [resolvable:$true] %s25_s12 }
   0x3   :  { %s67_s15 = scalar_lea.hbm %s159_s0, 128 }
   0x4   :  { %p68_p0 = scmp.ne.s32.totalorder %s159_s0, %s67_s15  ;;  %p71_p1 = scmp.lt.u32.totalorder %s67_s15, %s159_s0 }
   0x6   :  { %p73_p2 = pnand %p71_p1, %p68_p0 }
   0x8   :  { %76 = shalt.err (!%p73_p2)
}
   0x9   :  { %s77_s20 = scalar_lea.vmem %s16_s10, 128  ;;  %p82_p4 = scmp.lt.s32.totalorder %s16_s10, %s16_s10 }
   0xa   :  { %p78_p3 = scmp.ne.s32.totalorder %s16_s10, %s77_s20  ;;  %p83_p5 = scmp.lt.s32.totalorder %s77_s20, %s77_s20 }
   0xc   :  { %p84_p6 = por %p83_p5, %p82_p4 }
   0xe   :  { %p85_p7 = pnand %p84_p6, %p78_p3 }
  0x10   :  { %88 = shalt.err (!%p85_p7)
}
  0x11   :  { %18 = dma.hbm_to_vmem [thread:$0]  %s159_s0, 128, %s16_s10, [#allocation3]  }
  0x12   :  { %s89_s25 = scalar_lea.hbm %s160_s1, 128 }
  0x13   :  { %p90_p8 = scmp.ne.s32.totalorder %s160_s1, %s89_s25  ;;  %p93_p9 = scmp.lt.u32.totalorder %s89_s25, %s160_s1 }
  0x15   :  { %p95_p10 = pnand %p93_p9, %p90_p8 }
  0x17   :  { %98 = shalt.err (!%p95_p10)
}
  0x18   :  { %s99_s30 = scalar_lea.vmem %s26_s12, 128  ;;  %p104_p12 = scmp.lt.s32.totalorder %s26_s12, %s26_s12 }
  0x19   :  { %p100_p11 = scmp.ne.s32.totalorder %s26_s12, %s99_s30  ;;  %p105_p13 = scmp.lt.s32.totalorder %s99_s30, %s99_s30 }
  0x1b   :  { %p106_p0 = por %p105_p13, %p104_p12 }
  0x1d   :  { %p107_p1 = pnand %p106_p0, %p100_p11 }
  0x1f   :  { %110 = shalt.err (!%p107_p1)
}
  0x20   :  { %28 = dma.hbm_to_vmem [thread:$0]  %s160_s1, 128, %s26_s12, [#allocation5]  }
  0x21   :  { %111 = dma.done.wait [#allocation3], 128  }
  0x22   :  { %112 = vsyncadd [#allocation3], 4294967168 }
  0x23   :  { %113 = dma.done.wait [#allocation5], 128  }
  0x24   :  { %114 = vsyncadd [#allocation5], 4294967168  ;;  %v35_v0 = vld [vmem:[#allocation2] sm:$0xff]  ;;  %vm38_vm0 = vcmask 261120   ;;  %v36_v1 = vld [vmem:[#allocation4] sm:$0xff]  ;;  %vm55_vm1 = vcmask 7168  }
  0x25   :  { %v42_v2 = vmul.f32 %v35_v0, %v35_v0  ;;  %v46_v3 = vmul.f32 %v36_v1, %v36_v1  ;;  %v37_v4 = vmul.f32 %v36_v1, %v35_v0 }
  0x27   :  { %v43_v5 = vsel %vm38_vm0, %v42_v2, 0.0  ;;  %v39_v6 = vsel %vm38_vm0, %v37_v4, 0.0  ;;  %v47_v7 = vsel %vm38_vm0, %v46_v3, 0.0 }
  0x28   :  { %44 = vadd.xlane.f32.xlu0 %v43_v5  ;;  %40 = vadd.xlane.f32.xlu1 %v39_v6 }
  0x2c   :  { %48 = vadd.xlane.f32.xlu0 %v47_v7 }
  0xb5   :  { %v45_v8 = vpop.xlane.xlu0 %44  ;;  %v41_v12 = vpop.xlane.xlu1 %40 }
  0xb9   :  { %v49_v9 = vpop.xlane.xlu0 %48 }
  0xba   :  { %v50_v10 = vmul.f32 %v49_v9, %v45_v8 }
  0xbc   :  { %v51_v11 = vmax.f32 %v50_v10, 1e-16 }
  0xbe   :  { %65 = vrsqrt.f32 %v51_v11 }
  0xc8   :  { %v66_v13 = vpop.eup %65 }
  0xc9   :  { %v53_v14 = vmul.f32 %v66_v13, %v41_v12 }
  0xcb   :  { %v54_v15 = vsub.f32 1.0, %v53_v14 }
  0xcd   :  { %56 = vst.msk [vmem:[%s161_s2] sm:$0xff] %vm55_vm1, %v54_v15 }
  0xce   :  { %61 = vsyncpa [#allocation3], 1 }
  0xcf   :  { %62 = vsyncpa [#allocation5], 1 }

</bundles_post_ra>
